<compile_context>
chip_gen: v7x
topology: tpu7x:2x2x1
jax: 0.10.0
libtpu: 0.0.40
codegen_flags: <defaults>
</compile_context>

<pallas_src>
import numpy as np
import jax
import jax.numpy as jnp
from jax import lax
from jax.experimental import pallas as pl
from jax.experimental.pallas import tpu as pltpu


def _round_up(x, m):
    return -(-x // m) * m


def _bhp_kernel(frow_ref, fcolT_ref, trow_ref, tcol_ref, invw_ref,
                invwm1_ref, msum_ref, out_ref, m_run, l_run, d_run):
    # frow_ref:   [tm, D]   row tile of F, pre-scaled by 1/T
    # fcolT_ref:  [D, tn]   column tile of F^T (lane-dense along columns)
    # trow_ref:   [tm, 1]   int32 targets of the row tile (pad = C sentinel)
    # tcol_ref:   [1, tn]   int32 targets of the column tile (pad = C sentinel)
    # invw_ref:   [1, tn]   f32  1/cls_count[target_j]       (padded cols = 0)
    # invwm1_ref: [1, tn]   f32  1/(cls_count[target_j] - 1) (pad/degenerate = 0)
    # msum_ref:   [tm, 1]   f32  per-row positive count mask.sum(1) (pad = 0)
    # out_ref:    [tm, 1]   f32  per-row -mean_log_prob_pos
    # m_run/l_run/d_run: [tm,1] f32 scratch: running max / weighted exp-sum /
    #                    sum(mask*logits).  Reset at column step 0.
    tm = frow_ref.shape[0]
    tn = fcolT_ref.shape[1]
    j = pl.program_id(1)

    @pl.when(j == 0)
    def _init():
        m_run[...] = jnp.full_like(m_run, -jnp.inf)
        l_run[...] = jnp.zeros_like(l_run)
        d_run[...] = jnp.zeros_like(d_run)

    # [tm, tn] logits tile on the MXU; f32 accumulation, NN form (no transpose).
    logits = lax.dot_general(
        frow_ref[...], fcolT_ref[...],
        dimension_numbers=(((1,), (0,)), ((), ())),
        preferred_element_type=jnp.float32)

    # Small iotas; the compares broadcast to [tm, tn].
    row_idx = pl.program_id(0) * tm + lax.broadcasted_iota(jnp.int32, (tm, 1), 0)
    col_idx = j * tn + lax.broadcasted_iota(jnp.int32, (1, tn), 1)
    not_diag = row_idx != col_idx
    mask_b = jnp.logical_and(trow_ref[...] == tcol_ref[...], not_diag)

    # Denominator weight per element:
    #   positive (same class, not self): 1/(count-1)
    #   negative (not self, real col):   1/count
    #   self or padded column:           0
    weight = jnp.where(mask_b, invwm1_ref[...],
                       jnp.where(not_diag, invw_ref[...], 0.0))

    # Online accumulation of the weighted exp-sum (running max rescale).
    tile_max = jnp.max(logits, axis=1, keepdims=True)
    m_new = jnp.maximum(m_run[...], tile_max)
    scale = jnp.exp(m_run[...] - m_new)
    p = jnp.exp(logits - m_new)
    l_run[...] = l_run[...] * scale + jnp.sum(p * weight, axis=1, keepdims=True)
    m_run[...] = m_new

    # Numerator term sum(mask*logits) is shift-independent; accumulate raw.
    d_run[...] += jnp.sum(jnp.where(mask_b, logits, 0.0), axis=1, keepdims=True)

    @pl.when(j == pl.num_programs(1) - 1)
    def _finalize():
        msum = msum_ref[...]
        safe_m = jnp.where(msum > 0.0, msum, 1.0)
        z = jnp.maximum(l_run[...], 1e-30)
        # sum(mask*log_prob) = sum(mask*logits) - msum*(m + log z)
        mlpp = (d_run[...] - msum * (m_run[...] + jnp.log(z))) / safe_m
        # Padded rows have msum == 0 and d == 0, hence contribute exactly 0.
        out_ref[...] = -mlpp


def bhp_loss(proxy, features, targets, cls_num_list, proxy_num_list,
             temperature=0.1, tm_max=256, tn_max=512,
             matmul_dtype=jnp.float32):
    """Pallas implementation of BHP.forward(proxy, features, targets)."""
    B, V, D = features.shape
    assert V == 2, "BHP expects two views per sample"
    C = len(cls_num_list)
    P = int(np.sum(proxy_num_list))
    N = 2 * B + P

    targets = targets.astype(jnp.int32).reshape(-1)
    targets_proxy = jnp.asarray(
        np.concatenate([np.full((int(num),), i, dtype=np.int32)
                        for i, num in enumerate(proxy_num_list)]))
    targets_all = jnp.concatenate([targets, targets, targets_proxy], axis=0)  # [N]

    # batch_cls_count = eye(C)[targets].sum(0); per-element class count.
    cls_count = jnp.sum(jax.nn.one_hot(targets_all, C, dtype=jnp.float32), axis=0)
    cnt = cls_count[targets_all]                                              # [N]
    inv_w = 1.0 / cnt
    # 1/(count-1) is only ever selected when a positive exists (count >= 2);
    # clamp degenerate single-element classes to 0 so no inf is shipped.
    inv_wm1 = jnp.where(cnt > 1.0, 1.0 / jnp.maximum(cnt - 1.0, 1.0), 0.0)
    msum = cnt - 1.0                      # mask.sum(1) per row

    feats_all = jnp.concatenate(
        [features[:, 0, :], features[:, 1, :], proxy], axis=0).astype(jnp.float32)

    # Tiling: rows in tm-chunks ("parallel"), columns in tn-chunks ("arbitrary").
    tm = int(min(tm_max, _round_up(N, 8)))
    tn = int(min(tn_max, _round_up(N, 128)))
    np_r = _round_up(N, tm)
    np_c = _round_up(N, tn)
    pad_r, pad_c = np_r - N, np_c - N

    # Fold 1/T into the row operand once; pass the column operand pre-transposed.
    f_rows = jnp.pad(feats_all * jnp.float32(1.0 / temperature),
                     ((0, pad_r), (0, 0))).astype(matmul_dtype)
    f_colsT = jnp.pad(feats_all, ((0, pad_c), (0, 0))).T.astype(matmul_dtype)

    tgt_row = jnp.pad(targets_all, (0, pad_r), constant_values=C).reshape(np_r, 1)
    tgt_col = jnp.pad(targets_all, (0, pad_c), constant_values=C).reshape(1, np_c)
    invw_col = jnp.pad(inv_w, (0, pad_c)).reshape(1, np_c)        # pads -> 0
    invwm1_col = jnp.pad(inv_wm1, (0, pad_c)).reshape(1, np_c)    # pads -> 0
    msum_row = jnp.pad(msum, (0, pad_r)).reshape(np_r, 1)         # pads -> 0

    # Explicit VMEM budget: double-buffered tiles + ~10 [tm,tn] f32 temporaries,
    # with 2x headroom; clamped to [32 MiB, 64 MiB] (safe per-TC on all chips).
    est = 4 * (2 * tm * D + 2 * D * tn + 10 * tm * tn + 8 * (tm + tn) * 128)
    vmem_limit = int(min(64 * 1024 * 1024, max(32 * 1024 * 1024, 2 * est)))

    out = pl.pallas_call(
        _bhp_kernel,
        out_shape=jax.ShapeDtypeStruct((np_r, 1), jnp.float32),
        grid=(np_r // tm, np_c // tn),
        in_specs=[
            pl.BlockSpec((tm, D), lambda i, j: (i, 0)),   # F row tile (pre-scaled)
            pl.BlockSpec((D, tn), lambda i, j: (0, j)),   # F^T column tile
            pl.BlockSpec((tm, 1), lambda i, j: (i, 0)),   # row targets
            pl.BlockSpec((1, tn), lambda i, j: (0, j)),   # column targets
            pl.BlockSpec((1, tn), lambda i, j: (0, j)),   # 1/count
            pl.BlockSpec((1, tn), lambda i, j: (0, j)),   # 1/(count-1)
            pl.BlockSpec((tm, 1), lambda i, j: (i, 0)),   # per-row mask_sum
        ],
        out_specs=pl.BlockSpec((tm, 1), lambda i, j: (i, 0)),
        scratch_shapes=[pltpu.VMEM((tm, 1), jnp.float32)] * 3,
        compiler_params=pltpu.CompilerParams(
            dimension_semantics=("parallel", "arbitrary"),
            vmem_limit_bytes=vmem_limit),
    )(f_rows, f_colsT, tgt_row, tgt_col, invw_col, invwm1_col, msum_row)

    # Final mean over the N valid rows (padded rows contribute exactly 0).
    return jnp.sum(out) * jnp.float32(1.0 / N)


def bhp_loss_reference(proxy, features, targets, cls_num_list, proxy_num_list,
                       temperature=0.1):
    """Pure-JAX line-by-line port of the PyTorch forward (for verification)."""
    B = features.shape[0]
    C = len(cls_num_list)
    targets = targets.astype(jnp.int32).reshape(-1, 1)
    targets_proxy = jnp.asarray(
        np.concatenate([np.full((int(num), 1), i, dtype=np.int32)
                        for i, num in enumerate(proxy_num_list)]))
    targets_all = jnp.concatenate([jnp.tile(targets, (2, 1)), targets_proxy], axis=0)
    N = targets_all.shape[0]
    batch_cls_count = jnp.eye(C)[targets_all.reshape(-1)].sum(axis=0)
    mask = (targets_all == targets_all.T).astype(jnp.float32)
    logits_mask = jnp.ones((N, N)) - jnp.eye(N)
    mask = mask * logits_mask
    feats = jnp.concatenate([features[:, 0, :], features[:, 1, :], proxy], axis=0)
    logits = feats @ feats.T / temperature
    logits = logits - jnp.max(logits, axis=1, keepdims=True)
    exp_logits = jnp.exp(logits) * logits_mask
    per_ins_weight = batch_cls_count[targets_all.reshape(-1)].reshape(1, -1) - mask
    exp_logits_sum = jnp.sum(exp_logits / per_ins_weight, axis=1, keepdims=True)
    log_prob = logits - jnp.log(exp_logits_sum)
    mean_log_prob_pos = jnp.sum(mask * log_prob, axis=1) / jnp.sum(mask, axis=1)
    return jnp.mean(-mean_log_prob_pos)


if __name__ == "__main__":
    key = jax.random.PRNGKey(0)
    k1, k2, k3 = jax.random.split(key, 3)

    # Small config implied by the forward: B samples, 2 views, D feature dim,
    # C classes each with a few proxies.
    B, D = 8, 32
    cls_num_list = [10, 10, 10, 10]          # C = 4
    proxy_num_list = [2, 2, 2, 2]            # P = 8  -> N = 2*8 + 8 = 24
    temperature = 0.1

    features = jax.random.normal(k1, (B, 2, D), dtype=jnp.float32)
    features = features / jnp.linalg.norm(features, axis=-1, keepdims=True)
    P = int(np.sum(proxy_num_list))
    proxy = jax.random.normal(k2, (P, D), dtype=jnp.float32)
    proxy = proxy / jnp.linalg.norm(proxy, axis=-1, keepdims=True)
    targets = jax.random.randint(k3, (B,), 0, len(cls_num_list), dtype=jnp.int32)

    loss = bhp_loss(proxy, features, targets, cls_num_list, proxy_num_list,
                    temperature)
    loss = jax.block_until_ready(loss)

    loss_ref = bhp_loss_reference(proxy, features, targets, cls_num_list,
                                  proxy_num_list, temperature)
    loss_ref = jax.block_until_ready(loss_ref)

    assert np.isfinite(float(loss)), "loss is not finite"
    np.testing.assert_allclose(np.asarray(loss), np.asarray(loss_ref),
                               rtol=1e-5, atol=1e-5)
    print("KERNEL_OK")
</pallas_src>

<mosaic_0001>
module attributes {stable_mosaic.version = 11 : i64} {
  func.func @_bhp_kernel(%arg0: i32, %arg1: i32, %arg2: memref<24x32xf32, #tpu.memory_space<vmem>>, %arg3: memref<32x128xf32, #tpu.memory_space<vmem>>, %arg4: memref<24x1xi32, #tpu.memory_space<vmem>>, %arg5: memref<1x128xi32, #tpu.memory_space<vmem>>, %arg6: memref<1x128xf32, #tpu.memory_space<vmem>>, %arg7: memref<1x128xf32, #tpu.memory_space<vmem>>, %arg8: memref<24x1xf32, #tpu.memory_space<vmem>>, %arg9: memref<24x1xf32, #tpu.memory_space<vmem>>, %arg10: memref<24x1xf32, #tpu.memory_space<vmem>>, %arg11: memref<24x1xf32, #tpu.memory_space<vmem>>, %arg12: memref<24x1xf32, #tpu.memory_space<vmem>>) attributes {dimension_semantics = [#tpu.dimension_semantics<parallel>, #tpu.dimension_semantics<arbitrary>], iteration_bounds = array<i64: 1, 1>, scalar_prefetch = 0 : i64, scratch_operands = 3 : i64, tpu.core_type = #tpu.core_type<tc>, window_params = [{transform_indices = @transform_0, window_bounds = array<i64: 24, 32>}, {transform_indices = @transform_1, window_bounds = array<i64: 32, 128>}, {transform_indices = @transform_2, window_bounds = array<i64: 24, 1>}, {transform_indices = @transform_3, window_bounds = array<i64: 1, 128>}, {transform_indices = @transform_4, window_bounds = array<i64: 1, 128>}, {transform_indices = @transform_5, window_bounds = array<i64: 1, 128>}, {transform_indices = @transform_6, window_bounds = array<i64: 24, 1>}, {transform_indices = @transform_7, window_bounds = array<i64: 24, 1>}]} {
    %c0_i32 = arith.constant 0 : i32
    %0 = arith.cmpi eq, %arg1, %c0_i32 : i32
    %1 = arith.extui %0 : i1 to i32
    %c0_i32_0 = arith.constant 0 : i32
    %2 = arith.cmpi ne, %1, %c0_i32_0 : i32
    scf.if %2 {
      %cst_33 = arith.constant 0xFF800000 : f32
      %60 = vector.broadcast %cst_33 : f32 to vector<24x1xf32>
      %c0_34 = arith.constant 0 : index
      %c0_35 = arith.constant 0 : index
      %61 = vector.load %arg10[%c0_34, %c0_35] : memref<24x1xf32, #tpu.memory_space<vmem>>, vector<24x1xf32>
      tpu.vector_store %arg10[%c0_34, %c0_35], %60 {strides = array<i32>} : memref<24x1xf32, #tpu.memory_space<vmem>>, vector<24x1xf32>,
      %cst_36 = arith.constant 0.000000e+00 : f32
      %62 = vector.broadcast %cst_36 : f32 to vector<24x1xf32>
      %c0_37 = arith.constant 0 : index
      %c0_38 = arith.constant 0 : index
      %63 = vector.load %arg11[%c0_37, %c0_38] : memref<24x1xf32, #tpu.memory_space<vmem>>, vector<24x1xf32>
      tpu.vector_store %arg11[%c0_37, %c0_38], %62 {strides = array<i32>} : memref<24x1xf32, #tpu.memory_space<vmem>>, vector<24x1xf32>,
      %cst_39 = arith.constant 0.000000e+00 : f32
      %64 = vector.broadcast %cst_39 : f32 to vector<24x1xf32>
      %c0_40 = arith.constant 0 : index
      %c0_41 = arith.constant 0 : index
      %65 = vector.load %arg12[%c0_40, %c0_41] : memref<24x1xf32, #tpu.memory_space<vmem>>, vector<24x1xf32>
      tpu.vector_store %arg12[%c0_40, %c0_41], %64 {strides = array<i32>} : memref<24x1xf32, #tpu.memory_space<vmem>>, vector<24x1xf32>,
    } else {
    }
    %c0 = arith.constant 0 : index
    %c0_1 = arith.constant 0 : index
    %3 = vector.load %arg2[%c0, %c0_1] : memref<24x32xf32, #tpu.memory_space<vmem>>, vector<24x32xf32>
    %c0_2 = arith.constant 0 : index
    %c0_3 = arith.constant 0 : index
    %4 = vector.load %arg3[%c0_2, %c0_3] : memref<32x128xf32, #tpu.memory_space<vmem>>, vector<32x128xf32>
    %cst = arith.constant dense<0.000000e+00> : vector<24x128xf32>
    %5 = tpu.matmul %3, %4, %cst {dimension_numbers = #tpu.dot_dimension_numbers<[1], [0], [0], [1], [0, 0, 1, 1], [], []>} : vector<24x32xf32>, vector<32x128xf32>, vector<24x128xf32> -> vector<24x128xf32>
    %c24_i32 = arith.constant 24 : i32
    %6 = arith.muli %arg0, %c24_i32 : i32
    %7 = tpu.iota {dimensions = array<i32: 0>} : vector<24x1xi32>
    %8 = vector.broadcast %6 : i32 to vector<24x1xi32>
    %9 = arith.addi %8, %7 : vector<24x1xi32>
    %c128_i32 = arith.constant 128 : i32
    %10 = arith.muli %arg1, %c128_i32 : i32
    %11 = tpu.iota {dimensions = array<i32: 1>} : vector<1x128xi32>
    %12 = vector.broadcast %10 : i32 to vector<1x128xi32>
    %13 = arith.addi %12, %11 : vector<1x128xi32>
    %14 = vector.broadcast %9 : vector<24x1xi32> to vector<24x128xi32>
    %15 = vector.broadcast %13 : vector<1x128xi32> to vector<24x128xi32>
    %16 = arith.cmpi ne, %14, %15 : vector<24x128xi32>
    %c0_4 = arith.constant 0 : index
    %c0_5 = arith.constant 0 : index
    %17 = vector.load %arg4[%c0_4, %c0_5] : memref<24x1xi32, #tpu.memory_space<vmem>>, vector<24x1xi32>
    %c0_6 = arith.constant 0 : index
    %c0_7 = arith.constant 0 : index
    %18 = vector.load %arg5[%c0_6, %c0_7] : memref<1x128xi32, #tpu.memory_space<vmem>>, vector<1x128xi32>
    %19 = vector.broadcast %17 : vector<24x1xi32> to vector<24x128xi32>
    %20 = vector.broadcast %18 : vector<1x128xi32> to vector<24x128xi32>
    %21 = arith.cmpi eq, %19, %20 : vector<24x128xi32>
    %22 = arith.andi %21, %16 : vector<24x128xi1>
    %c0_8 = arith.constant 0 : index
    %c0_9 = arith.constant 0 : index
    %23 = vector.load %arg7[%c0_8, %c0_9] : memref<1x128xf32, #tpu.memory_space<vmem>>, vector<1x128xf32>
    %c0_10 = arith.constant 0 : index
    %c0_11 = arith.constant 0 : index
    %24 = vector.load %arg6[%c0_10, %c0_11] : memref<1x128xf32, #tpu.memory_space<vmem>>, vector<1x128xf32>
    %cst_12 = arith.constant 0.000000e+00 : f32
    %25 = vector.shape_cast %24 : vector<1x128xf32> to vector<1x128xf32>
    %26 = vector.broadcast %25 : vector<1x128xf32> to vector<24x128xf32>
    %27 = vector.broadcast %cst_12 : f32 to vector<24x128xf32>
    %28 = arith.select %16, %26, %27 : vector<24x128xi1>, vector<24x128xf32>
    %29 = vector.shape_cast %23 : vector<1x128xf32> to vector<1x128xf32>
    %30 = vector.broadcast %29 : vector<1x128xf32> to vector<24x128xf32>
    %31 = arith.select %22, %30, %28 : vector<24x128xi1>, vector<24x128xf32>
    %cst_13 = arith.constant dense<0xFF800000> : vector<24xf32>
    %32 = vector.multi_reduction <maximumf>, %5, %cst_13 [1] : vector<24x128xf32> to vector<24xf32>
    %33 = vector.shape_cast %32 : vector<24xf32> to vector<24x1xf32>
    %c0_14 = arith.constant 0 : index
    %c0_15 = arith.constant 0 : index
    %34 = vector.load %arg10[%c0_14, %c0_15] : memref<24x1xf32, #tpu.memory_space<vmem>>, vector<24x1xf32>
    %35 = arith.maximumf %34, %33 : vector<24x1xf32>
    %c0_16 = arith.constant 0 : index
    %c0_17 = arith.constant 0 : index
    %36 = vector.load %arg10[%c0_16, %c0_17] : memref<24x1xf32, #tpu.memory_space<vmem>>, vector<24x1xf32>
    %37 = arith.subf %36, %35 : vector<24x1xf32>
    %38 = math.exp %37 : vector<24x1xf32>
    %39 = vector.broadcast %35 : vector<24x1xf32> to vector<24x128xf32>
    %40 = arith.subf %5, %39 : vector<24x128xf32>
    %41 = math.exp %40 : vector<24x128xf32>
    %c0_18 = arith.constant 0 : index
    %c0_19 = arith.constant 0 : index
    %42 = vector.load %arg11[%c0_18, %c0_19] : memref<24x1xf32, #tpu.memory_space<vmem>>, vector<24x1xf32>
    %43 = arith.mulf %42, %38 : vector<24x1xf32>
    %44 = arith.mulf %41, %31 : vector<24x128xf32>
    %cst_20 = arith.constant dense<0.000000e+00> : vector<24xf32>
    %45 = vector.multi_reduction <add>, %44, %cst_20 [1] : vector<24x128xf32> to vector<24xf32>
    %46 = vector.shape_cast %45 : vector<24xf32> to vector<24x1xf32>
    %47 = arith.addf %43, %46 : vector<24x1xf32>
    %c0_21 = arith.constant 0 : index
    %c0_22 = arith.constant 0 : index
    %48 = vector.load %arg11[%c0_21, %c0_22] : memref<24x1xf32, #tpu.memory_space<vmem>>, vector<24x1xf32>
    tpu.vector_store %arg11[%c0_21, %c0_22], %47 {strides = array<i32>} : memref<24x1xf32, #tpu.memory_space<vmem>>, vector<24x1xf32>,
    %c0_23 = arith.constant 0 : index
    %c0_24 = arith.constant 0 : index
    %49 = vector.load %arg10[%c0_23, %c0_24] : memref<24x1xf32, #tpu.memory_space<vmem>>, vector<24x1xf32>
    tpu.vector_store %arg10[%c0_23, %c0_24], %35 {strides = array<i32>} : memref<24x1xf32, #tpu.memory_space<vmem>>, vector<24x1xf32>,
    %c0_25 = arith.constant 0 : index
    %c0_26 = arith.constant 0 : index
    %50 = vector.load %arg12[%c0_25, %c0_26] : memref<24x1xf32, #tpu.memory_space<vmem>>, vector<24x1xf32>
    %cst_27 = arith.constant 0.000000e+00 : f32
    %51 = vector.broadcast %cst_27 : f32 to vector<24x128xf32>
    %52 = arith.select %22, %5, %51 : vector<24x128xi1>, vector<24x128xf32>
    %cst_28 = arith.constant dense<0.000000e+00> : vector<24xf32>
    %53 = vector.multi_reduction <add>, %52, %cst_28 [1] : vector<24x128xf32> to vector<24xf32>
    %54 = vector.shape_cast %53 : vector<24xf32> to vector<24x1xf32>
    %55 = arith.addf %50, %54 : vector<24x1xf32>
    %c0_29 = arith.constant 0 : index
    %c0_30 = arith.constant 0 : index
    %56 = vector.load %arg12[%c0_29, %c0_30] : memref<24x1xf32, #tpu.memory_space<vmem>>, vector<24x1xf32>
    tpu.vector_store %arg12[%c0_29, %c0_30], %55 {strides = array<i32>} : memref<24x1xf32, #tpu.memory_space<vmem>>, vector<24x1xf32>,
    %c0_i32_31 = arith.constant 0 : i32
    %57 = arith.cmpi eq, %arg1, %c0_i32_31 : i32
    %58 = arith.extui %57 : i1 to i32
    %c0_i32_32 = arith.constant 0 : i32
    %59 = arith.cmpi ne, %58, %c0_i32_32 : i32
    scf.if %59 {
      %c0_33 = arith.constant 0 : index
      %c0_34 = arith.constant 0 : index
      %60 = vector.load %arg8[%c0_33, %c0_34] : memref<24x1xf32, #tpu.memory_space<vmem>>, vector<24x1xf32>
      %cst_35 = arith.constant 0.000000e+00 : f32
      %61 = vector.broadcast %cst_35 : f32 to vector<24x1xf32>
      %62 = arith.cmpf ogt, %60, %61 : vector<24x1xf32>
      %cst_36 = arith.constant 1.000000e+00 : f32
      %63 = vector.broadcast %cst_36 : f32 to vector<24x1xf32>
      %64 = arith.select %62, %60, %63 : vector<24x1xi1>, vector<24x1xf32>
      %c0_37 = arith.constant 0 : index
      %c0_38 = arith.constant 0 : index
      %65 = vector.load %arg11[%c0_37, %c0_38] : memref<24x1xf32, #tpu.memory_space<vmem>>, vector<24x1xf32>
      %cst_39 = arith.constant 1.000000e-30 : f32
      %66 = vector.broadcast %cst_39 : f32 to vector<24x1xf32>
      %67 = arith.maximumf %65, %66 : vector<24x1xf32>
      %c0_40 = arith.constant 0 : index
      %c0_41 = arith.constant 0 : index
      %68 = vector.load %arg12[%c0_40, %c0_41] : memref<24x1xf32, #tpu.memory_space<vmem>>, vector<24x1xf32>
      %c0_42 = arith.constant 0 : index
      %c0_43 = arith.constant 0 : index
      %69 = vector.load %arg10[%c0_42, %c0_43] : memref<24x1xf32, #tpu.memory_space<vmem>>, vector<24x1xf32>
      %70 = math.log %67 : vector<24x1xf32>
      %71 = arith.addf %69, %70 : vector<24x1xf32>
      %72 = arith.mulf %60, %71 : vector<24x1xf32>
      %73 = arith.subf %68, %72 : vector<24x1xf32>
      %74 = arith.divf %73, %64 : vector<24x1xf32>
      %cst_44 = arith.constant 0.000000e+00 : f32
      %75 = vector.broadcast %cst_44 : f32 to vector<24x1xf32>
      %76 = arith.subf %75, %74 : vector<24x1xf32>
      %c0_45 = arith.constant 0 : index
      %c0_46 = arith.constant 0 : index
      %77 = vector.load %arg9[%c0_45, %c0_46] : memref<24x1xf32, #tpu.memory_space<vmem>>, vector<24x1xf32>
      tpu.vector_store %arg9[%c0_45, %c0_46], %76 {strides = array<i32>} : memref<24x1xf32, #tpu.memory_space<vmem>>, vector<24x1xf32>,
    } else {
    }
    return
  }
  func.func @transform_0(%arg0: i32, %arg1: i32) -> (i32, i32) {
    %c0_i32 = arith.constant 0 : i32
    %c0_i32_0 = arith.constant 0 : i32
    return %arg0, %c0_i32 : i32, i32
  }
  func.func @transform_1(%arg0: i32, %arg1: i32) -> (i32, i32) {
    %c0_i32 = arith.constant 0 : i32
    %c0_i32_0 = arith.constant 0 : i32
    return %c0_i32, %arg1 : i32, i32
  }
  func.func @transform_2(%arg0: i32, %arg1: i32) -> (i32, i32) {
    %c0_i32 = arith.constant 0 : i32
    %c0_i32_0 = arith.constant 0 : i32
    return %arg0, %c0_i32 : i32, i32
  }
  func.func @transform_3(%arg0: i32, %arg1: i32) -> (i32, i32) {
    %c0_i32 = arith.constant 0 : i32
    %c0_i32_0 = arith.constant 0 : i32
    return %c0_i32, %arg1 : i32, i32
  }
  func.func @transform_4(%arg0: i32, %arg1: i32) -> (i32, i32) {
    %c0_i32 = arith.constant 0 : i32
    %c0_i32_0 = arith.constant 0 : i32
    return %c0_i32, %arg1 : i32, i32
  }
  func.func @transform_5(%arg0: i32, %arg1: i32) -> (i32, i32) {
    %c0_i32 = arith.constant 0 : i32
    %c0_i32_0 = arith.constant 0 : i32
    return %c0_i32, %arg1 : i32, i32
  }
  func.func @transform_6(%arg0: i32, %arg1: i32) -> (i32, i32) {
    %c0_i32 = arith.constant 0 : i32
    %c0_i32_0 = arith.constant 0 : i32
    return %arg0, %c0_i32 : i32, i32
  }
  func.func @transform_7(%arg0: i32, %arg1: i32) -> (i32, i32) {
    %c0_i32 = arith.constant 0 : i32
    %c0_i32_0 = arith.constant 0 : i32
    return %arg0, %c0_i32 : i32, i32
  }
}

</mosaic_0001>

<bundles_post_ra>
// kernel: tpu_custom_call.1
= control target key start
LH: loop header
LB: loop body
LE: loop exit
PB: predicated region body
PF: predicated region fallthrough
CT: control target
= control target key end

     0   :  { %12 = vsyncpa [#allocation6], 0  ;;  %s453_s24 = smov [#allocation5]   ;;  %s652_s0 = inlined_call_operand.hbm [shape: f32[24,32], index: 0, kind: input, shape index: {}]   ;;  %s653_s1 = inlined_call_operand.vmem [shape: f32[32,128], index: 1, kind: input, shape index: {}]   ;;  %s654_s2 = inlined_call_operand.vmem [shape: s32[24,1], index: 2, kind: input, shape index: {}]   ;;  %s655_s3 = inlined_call_operand.vmem [shape: s32[1,128], index: 3, kind: input, shape index: {}]   ;;  %s656_s4 = inlined_call_operand.vmem [shape: f32[1,128], index: 4, kind: input, shape index: {}]   ;;  %s657_s5 = inlined_call_operand.vmem [shape: f32[1,128], index: 5, kind: input, shape index: {}]   ;;  %s658_s6 = inlined_call_operand.vmem [shape: f32[24,1], index: 6, kind: input, shape index: {}]   ;;  %s659_s7 = inlined_call_operand.vmem [shape: f32[24,1], index: 7, kind: output, shape index: {}]  }
   0x1   :  { %s18_s25 = sshll.u32 %s453_s24, 4  ;;  %s429_s28 = scalar_lea.hbm %s652_s0, 384  ;;  %s19_s25 = int_to_ptr.vmem [resolvable:$true] %s18_s25 }
   0x2   :  { %p430_p0 = scmp.ne.s32.totalorder %s652_s0, %s429_s28  ;;  %p433_p1 = scmp.lt.u32.totalorder %s429_s28, %s652_s0 }
   0x4   :  { %p435_p2 = pnand %p433_p1, %p430_p0 }
   0x6   :  { %438 = shalt.err (!%p435_p2)
}
   0x7   :  { %s439_s10 = scalar_lea.vmem %s19_s25, 384  ;;  %p444_p4 = scmp.lt.s32.totalorder %s19_s25, %s19_s25 }
   0x8   :  { %p440_p3 = scmp.ne.s32.totalorder %s19_s25, %s439_s10  ;;  %p445_p5 = scmp.lt.s32.totalorder %s439_s10, %s439_s10 }
   0xa   :  { %p446_p6 = por %p445_p5, %p444_p4 }
   0xc   :  { %p447_p7 = pnand %p446_p6, %p440_p3 }
   0xe   :  { %450 = shalt.err (!%p447_p7)
}
   0xf   :  { %s454_s11 = smov 128   ;;  %s455_s12 = smov 8  }
  0x10   :  { %24 = dma.hbm_to_vmem [thread:$0]  %s652_s0, 384, %s19_s25, [#allocation6], %s454_s11, %s454_s11, %s455_s12  }
  0x11   :  { %451 = dma.done.wait [#allocation6], 384  }
  0x12   :  { %452 = vsyncadd [#allocation6], 4294966912  ;;  %v456_v0 = vmov 0.0|0.0   ;;  %vm457_vm0 = vmmov 0   ;;  %v458_v1 = vmov 0.0   ;;  %v57_v2 = vld [vmem:[%s653_s1] sm:$0xff]  ;;  %v152_v35 = vlaneseq }
  0x13   :  { %385 = vmatprep.subr.bf16.mxu0 %v456_v0  ;;  %391 = vmatprep.subr.bf16.mxu1 %v456_v0  ;;  %v58_v3 = vld [vmem:[%s653_s1 + $0x8] sm:$0xff]  ;;  %v59_v4 = vld [vmem:[%s653_s1 + $0x10] sm:$0xff]  ;;  %v60_v6 = vld [vmem:[%s653_s1 + $0x18] sm:$0xff]  ;;  %vm61_vm1 = vcmask 261120   ;;  %vm44_vm2 = vcmask 7168   ;;  %v459_v11 = vmov -inf  }
  0x14   :  { %376 = vmatprep.mubr.msk.f32.mxu0 %vm457_vm0, %v458_v1  ;;  %379 = vmatprep.mubr.msk.f32.mxu1 %vm457_vm0, %v458_v1  ;;  %v386_v5 = vpack.c.bf16 %v58_v3, %v57_v2  ;;  %v389_v7 = vpack.c.bf16 %v60_v6, %v59_v4  ;;  %v54_v8 = vld [vmem:[#allocation5] sm:$0xff]  ;;  %v55_v9 = vld [vmem:[#allocation5 + $0x8] sm:$0xff]  ;;  %v56_v10 = vld [vmem:[#allocation5 + $0x10] sm:$0xff]  ;;  %45 = vst.msk [vmem:[#allocation2] sm:$0xff] %vm44_vm2, %v459_v11  ;;  %v460_v18 = vmov 0   ;;  %v153_v40 = vshrl.u32 %v152_v35, 7 }
  0x15   :  { %46 = vst.msk [vmem:[#allocation2 + $0x8] sm:$0xff] %vm44_vm2, %v459_v11  ;;  %47 = vst.msk [vmem:[#allocation2 + $0x10] sm:$0xff] %vm44_vm2, %v459_v11  ;;  %403 = vset.pattern.permute.xlu1 %v460_v18  ;;  %404 = vset.pattern.permute.xlu0 %v460_v18  ;;  %v168_v31 = vld [vmem:[%s654_s2] sm:$0xff]  ;;  %v169_v32 = vld [vmem:[%s654_s2 + $0x8] sm:$0xff]  ;;  %v162_v41 = vand.u32 127, %v152_v35 }
  0x16   :  { %387 = vmatpush3.bf16.msra.mxu0 %v386_v5  ;;  %393 = vmatpush3.bf16.msra.mxu1 %v386_v5  ;;  %48 = vst.msk [vmem:[#allocation3] sm:$0xff] %vm44_vm2, %v458_v1  ;;  %49 = vst.msk [vmem:[#allocation3 + $0x8] sm:$0xff] %vm44_vm2, %v458_v1  ;;  %v170_v33 = vld [vmem:[%s654_s2 + $0x10] sm:$0xff]  ;;  %v358_v44 = vld [vmem:[%s655_s3] ss:$0 sm:$0xff]  ;;  %v154_v49 = vadd.s32 8, %v153_v40 }
  0x17   :  { %388 = vmatprep.subr.bf16.mxu0 %v456_v0  ;;  %392 = vmatprep.subr.bf16.mxu1 %v456_v0  ;;  %50 = vst.msk [vmem:[#allocation3 + $0x10] sm:$0xff] %vm44_vm2, %v458_v1  ;;  %51 = vst.msk [vmem:[#allocation4] sm:$0xff] %vm44_vm2, %v458_v1  ;;  %vm165_vm3 = vcmp.ne.s32.totalorder %v153_v40, %v162_v41  ;;  %v359_v48 = vld [vmem:[%s656_s4] ss:$0 sm:$0xff]  ;;  %v155_v50 = vadd.s32 16, %v153_v40 }
  0x18   :  { %52 = vst.msk [vmem:[#allocation4 + $0x8] sm:$0xff] %vm44_vm2, %v458_v1  ;;  %53 = vst.msk [vmem:[#allocation4 + $0x10] sm:$0xff] %vm44_vm2, %v458_v1  ;;  %v199_v51 = vsel %vm165_vm3, %v359_v48, 0.0  ;;  %v360_v54 = vld [vmem:[%s657_s5] ss:$0 sm:$0xff]  ;;  %vm166_vm6 = vcmp.ne.s32.totalorder %v154_v49, %v162_v41 }
  0x19   :  { %vm167_vm8 = vcmp.ne.s32.totalorder %v155_v50, %v162_v41  ;;  %v200_v57 = vsel %vm166_vm6, %v359_v48, 0.0  ;;  %v304_v41 = vld [vmem:[%s658_s6 + $0x10] sm:$0xff] }
  0x1a   :  { %390 = vmatpush3.bf16.msra.mxu0 %v389_v7  ;;  %394 = vmatpush3.bf16.msra.mxu1 %v389_v7  ;;  %v201_v59 = vsel %vm167_vm8, %v359_v48, 0.0  ;;  %vm307_vm14 = vcmp.gt.f32.partialorder %v304_v41, 0.0 }
  0x1b   :  { %v546_v19 = vld [vmem:[#allocation2] sm:$0xff] }
  0x1c   :  { %v551_v22 = vld [vmem:[#allocation2 + $0x10] sm:$0xff]  ;;  %v553_v23 = vld [vmem:[#allocation2 + $0x8] sm:$0xff] }
  0x1d   :  { %377 = vmatmul.mubr.msk.f32.vlgmr.msra.gmra.mrb[0].mxu0 %vm61_vm1, %v54_v8  ;;  %380 = vmatmul.mubr.msk.f32.vlgmr.msra.gmra.mrb[0].mxu1 %vm61_vm1, %v55_v9  ;;  %v256_v11 = vld [vmem:[#allocation3] sm:$0xff] }
  0x1e   :  { %382 = vmatprep.mubr.msk.f32.mxu1 %vm457_vm0, %v458_v1  ;;  %v258_v18 = vld [vmem:[#allocation3 + $0x10] sm:$0xff] }
  0x21   :  { %383 = vmatmul.mubr.msk.f32.gmra.mrb[2].mxu1 %vm61_vm1, %v56_v10 }
  0xf0   :  { %v537_v12 = vpop.f32.mrb[0].mxu0  ;;  %v539_v13 = vpop.f32.mrb[0].mxu1 }
  0xf1   :  { %v381_v14 = vpop.f32.mrb[1].mxu1  ;;  %211 = vmax.xlane.f32.xlu0 %v537_v12  ;;  %v378_v15 = vpop.f32.mrb[1].mxu0 }
  0xf2   :  { %v257_v15 = vld [vmem:[#allocation3 + $0x8] sm:$0xff] }
  0xf4   :  { %v542_v16 = vpop.f32.mrb[2].mxu1 }
  0xf5   :  { %215 = vmax.xlane.f32.xlu1 %v542_v16  ;;  %v384_v17 = vpop.f32.mrb[3].mxu1  ;;  %213 = vmax.xlane.f32.xlu0 %v539_v13 }
 0x17e   :  { %v212_v20 = vpop.xlane.xlu0 %211 }
 0x17f   :  { %v549_v21 = vmax.f32 %v546_v19, %v212_v20 }
 0x181   :  { %v223_v24 = vsub.f32 %v546_v19, %v549_v21  ;;  %278 = vst.msk [vmem:[#allocation2] sm:$0xff] %vm44_vm2, %v549_v21  ;;  %234 = vperm.xlu1 %403, %v549_v21  }
 0x182   :  { %v216_v25 = vpop.xlane.xlu1 %215  ;;  %v214_v26 = vpop.xlane.xlu0 %213 }
 0x183   :  { %v561_v27 = vmax.f32 %v551_v22, %v216_v25  ;;  %v564_v28 = vmax.f32 %v553_v23, %v214_v26  ;;  %v226_v7 = vmul.f32 1.442695, %v223_v24  ;;  %v283_v25 = vld [vmem:[#allocation4 + $0x10] sm:$0xff]  ;;  %v281_v26 = vld [vmem:[#allocation4] sm:$0xff] }
 0x185   :  { %v225_v29 = vsub.f32 %v551_v22, %v561_v27  ;;  %280 = vst.msk [vmem:[#allocation2 + $0x10] sm:$0xff] %vm44_vm2, %v561_v27  ;;  %v224_v30 = vsub.f32 %v553_v23, %v564_v28  ;;  %279 = vst.msk [vmem:[#allocation2 + $0x8] sm:$0xff] %vm44_vm2, %v564_v28  ;;  %239 = vperm.xlu0 %404, %v564_v28   ;;  %244 = vperm.xlu1 %403, %v561_v27  }
 0x187   :  { %v228_v8 = vmul.f32 1.442695, %v224_v30  ;;  %v230_v9 = vmul.f32 1.442695, %v225_v29 }
 0x188   :  { %v320_v48 = vld [vmem:[#allocation2] sm:$0xff] }
 0x189   :  { %173 = vperm.xlu1 %403, %v168_v31   ;;  %v302_v31 = vld [vmem:[%s658_s6] sm:$0xff] }
 0x18a   :  { %vm305_vm12 = vcmp.gt.f32.partialorder %v302_v31, 0.0 }
 0x18c   :  { %v322_v58 = vld [vmem:[#allocation2 + $0x10] sm:$0xff] }
 0x18d   :  { %176 = vperm.xlu1 %403, %v169_v32  }
 0x191   :  { %179 = vperm.xlu1 %403, %v170_v33  }
 0x200   :  { %v235_v34 = vpop.permute.xlu1 %234 }
 0x201   :  { %v247_v36 = vsub.f32 %v537_v12, %v235_v34  ;;  %v282_v34 = vld [vmem:[#allocation4 + $0x8] sm:$0xff] }
 0x203   :  { %v250_v37 = vmul.f32 1.442695, %v247_v36 }
 0x204   :  { %v240_v38 = vpop.permute.xlu0 %239  ;;  %v245_v39 = vpop.permute.xlu1 %244 }
 0x205   :  { %405 = vpow2.f32 %v250_v37  ;;  %v248_v42 = vsub.f32 %v539_v13, %v240_v38  ;;  %v249_v43 = vsub.f32 %v542_v16, %v245_v39  ;;  %v303_v37 = vld [vmem:[%s658_s6 + $0x8] sm:$0xff] }
 0x206   :  { %vm306_vm13 = vcmp.gt.f32.partialorder %v303_v37, 0.0 }
 0x207   :  { %v252_v45 = vmul.f32 1.442695, %v248_v42  ;;  %v254_v46 = vmul.f32 1.442695, %v249_v43  ;;  %v308_v43 = vsel %vm305_vm12, %v302_v31, 1.0 }
 0x208   :  { %v174_v47 = vpop.permute.xlu1 %173 }
 0x209   :  { %407 = vpow2.f32 %v252_v45  ;;  %vm185_vm4 = vcmp.eq.s32.totalorder %v174_v47, %v358_v44  ;;  %v310_v45 = vsel %vm307_vm14, %v304_v41, 1.0 }
 0x20a   :  { %409 = vpow2.f32 %v254_v46  ;;  %vm594_vm5 = vmand %vm185_vm4, %vm165_vm3 }
 0x20b   :  { %v208_v56 = vsel %vm594_vm5, %v360_v54, %v199_v51  ;;  %v284_v5 = vsel %vm594_vm5, %v537_v12, 0.0  ;;  %411 = vpow2.f32 %v226_v7 }
 0x20c   :  { %v177_v53 = vpop.permute.xlu1 %176  ;;  %413 = vpow2.f32 %v228_v8 }
 0x20d   :  { %vm186_vm7 = vcmp.eq.s32.totalorder %v177_v53, %v358_v44  ;;  %415 = vpow2.f32 %v230_v9 }
 0x20e   :  { %vm603_vm9 = vmand %vm186_vm7, %vm166_vm6 }
 0x20f   :  { %v406_v55 = vpop.eup %405  ;;  %v209_v63 = vsel %vm603_vm9, %v360_v54, %v200_v57  ;;  %v285_v6 = vsel %vm603_vm9, %v539_v13, 0.0 }
 0x210   :  { %v180_v60 = vpop.permute.xlu1 %179  ;;  %v262_v61 = vmul.f32 %v406_v55, %v208_v56  ;;  %v321_v55 = vld [vmem:[#allocation2 + $0x8] sm:$0xff] }
 0x211   :  { %vm187_vm10 = vcmp.eq.s32.totalorder %v180_v60, %v358_v44  ;;  %v309_v44 = vsel %vm306_vm13, %v303_v37, 1.0 }
 0x212   :  { %vm190_vm11 = vmand %vm187_vm10, %vm167_vm8  ;;  %265 = vadd.xlane.f32.xlu1 %v262_v61 }
 0x213   :  { %v408_v62 = vpop.eup %407  ;;  %v210_v0 = vsel %vm190_vm11, %v360_v54, %v201_v59  ;;  %v286_v4 = vsel %vm190_vm11, %v542_v16, 0.0 }
 0x214   :  { %v410_v1 = vpop.eup %409  ;;  %v263_v2 = vmul.f32 %v408_v62, %v209_v63 }
 0x215   :  { %v264_v3 = vmul.f32 %v410_v1, %v210_v0  ;;  %v412_v10 = vpop.eup %411 }
 0x216   :  { %267 = vadd.xlane.f32.xlu0 %v263_v2  ;;  %v259_v12 = vmul.f32 %v412_v10, %v256_v11  ;;  %v414_v13 = vpop.eup %413 }
 0x217   :  { %269 = vadd.xlane.f32.xlu1 %v264_v3  ;;  %v416_v16 = vpop.eup %415  ;;  %v260_v19 = vmul.f32 %v414_v13, %v257_v15 }
 0x218   :  { %v261_v21 = vmul.f32 %v416_v16, %v258_v18 }
 0x21a   :  { %291 = vadd.xlane.f32.xlu0 %v286_v4 }
 0x21b   :  { %287 = vadd.xlane.f32.xlu1 %v284_v5 }
 0x21f   :  { %289 = vadd.xlane.f32.xlu1 %v285_v6 }
 0x29f   :  { %v266_v14 = vpop.xlane.xlu1 %265 }
 0x2a0   :  { %v271_v17 = vadd.f32 %v266_v14, %v259_v12 }
 0x2a2   :  { %275 = vst.msk [vmem:[#allocation3] sm:$0xff] %vm44_vm2, %v271_v17 }
 0x2a3   :  { %v268_v20 = vpop.xlane.xlu0 %267 }
 0x2a4   :  { %v272_v23 = vadd.f32 %v268_v20, %v260_v19  ;;  %v270_v24 = vpop.xlane.xlu1 %269 }
 0x2a5   :  { %v273_v22 = vadd.f32 %v270_v24, %v261_v21 }
 0x2a6   :  { %276 = vst.msk [vmem:[#allocation3 + $0x8] sm:$0xff] %vm44_vm2, %v272_v23 }
 0x2a7   :  { %277 = vst.msk [vmem:[#allocation3 + $0x10] sm:$0xff] %vm44_vm2, %v273_v22  ;;  %v292_v27 = vpop.xlane.xlu0 %291 }
 0x2a8   :  { %v295_v28 = vadd.f32 %v292_v27, %v283_v25  ;;  %v288_v29 = vpop.xlane.xlu1 %287 }
 0x2a9   :  { %v311_v30 = vld [vmem:[#allocation3] sm:$0xff]  ;;  %v293_v32 = vadd.f32 %v288_v29, %v281_v26 }
 0x2aa   :  { %v314_v33 = vmax.f32 %v311_v30, 1e-30  ;;  %298 = vst.msk [vmem:[#allocation4 + $0x10] sm:$0xff] %vm44_vm2, %v295_v28 }
 0x2ab   :  { %296 = vst.msk [vmem:[#allocation4] sm:$0xff] %vm44_vm2, %v293_v32 }
 0x2ac   :  { %417 = vlog2.f32 %v314_v33  ;;  %v290_v35 = vpop.xlane.xlu1 %289 }
 0x2ad   :  { %v312_v36 = vld [vmem:[#allocation3 + $0x8] sm:$0xff]  ;;  %v294_v38 = vadd.f32 %v290_v35, %v282_v34 }
 0x2ae   :  { %v315_v39 = vmax.f32 %v312_v36, 1e-30  ;;  %v313_v40 = vld [vmem:[#allocation3 + $0x10] sm:$0xff] }
 0x2af   :  { %v316_v42 = vmax.f32 %v313_v40, 1e-30  ;;  %297 = vst.msk [vmem:[#allocation4 + $0x8] sm:$0xff] %vm44_vm2, %v294_v38 }
 0x2b0   :  { %419 = vlog2.f32 %v315_v39 }
 0x2b1   :  { %421 = vlog2.f32 %v316_v42  ;;  %v319_v4 = vld [vmem:[#allocation4 + $0x10] sm:$0xff] }
 0x2b2   :  { %423 = vrcp.f32 %v308_v43  ;;  %v317_v57 = vld [vmem:[#allocation4] sm:$0xff] }
 0x2b3   :  { %425 = vrcp.f32 %v309_v44 }
 0x2b4   :  { %427 = vrcp.f32 %v310_v45 }
 0x2b6   :  { %v418_v46 = vpop.eup %417  ;;  %v318_v2 = vld [vmem:[#allocation4 + $0x8] sm:$0xff] }
 0x2b7   :  { %v324_v47 = vmul.f32 0.6931472, %v418_v46 }
 0x2b9   :  { %v329_v49 = vadd.f32 %v324_v47, %v320_v48 }
 0x2ba   :  { %v420_v50 = vpop.eup %419 }
 0x2bb   :  { %v422_v51 = vpop.eup %421  ;;  %v326_v52 = vmul.f32 0.6931472, %v420_v50  ;;  %v332_v53 = vmul.f32 %v329_v49, %v302_v31 }
 0x2bc   :  { %v424_v54 = vpop.eup %423  ;;  %v328_v56 = vmul.f32 0.6931472, %v422_v51 }
 0x2bd   :  { %v335_v59 = vsub.f32 %v317_v57, %v332_v53  ;;  %v330_v60 = vadd.f32 %v326_v52, %v321_v55  ;;  %v426_v0 = vpop.eup %425 }
 0x2be   :  { %v331_v61 = vadd.f32 %v328_v56, %v322_v58  ;;  %v428_v3 = vpop.eup %427 }
 0x2bf   :  { %v339_v62 = vmul.f32 %v424_v54, %v335_v59  ;;  %v333_v63 = vmul.f32 %v330_v60, %v303_v37 }
 0x2c0   :  { %v334_v1 = vmul.f32 %v331_v61, %v304_v41 }
 0x2c1   :  { %v344_v5 = vsub.f32 0.0, %v339_v62  ;;  %v336_v6 = vsub.f32 %v318_v2, %v333_v63 }
 0x2c2   :  { %v337_v7 = vsub.f32 %v319_v4, %v334_v1 }
 0x2c3   :  { %347 = vst.msk [vmem:[%s659_s7] sm:$0xff] %vm44_vm2, %v344_v5  ;;  %v341_v8 = vmul.f32 %v426_v0, %v336_v6 }
 0x2c4   :  { %v343_v9 = vmul.f32 %v428_v3, %v337_v7 }
 0x2c5   :  { %v345_v10 = vsub.f32 0.0, %v341_v8 }
 0x2c6   :  { %v346_v11 = vsub.f32 0.0, %v343_v9 }
 0x2c7   :  { %348 = vst.msk [vmem:[%s659_s7 + $0x8] sm:$0xff] %vm44_vm2, %v345_v10 }
 0x2c8   :  { %349 = vst.msk [vmem:[%s659_s7 + $0x10] sm:$0xff] %vm44_vm2, %v346_v11 }
 0x2c9   :  { %354 = vsyncpa [#allocation6], 1 }

</bundles_post_ra>
